<compile_context>
chip_gen: v6e
topology: v6e:2x2x1
jax: 0.10.0
libtpu: 0.0.40
codegen_flags: <defaults>
</compile_context>

<pallas_src>
import jax
import jax.numpy as jnp
from jax import lax
from jax.experimental import pallas as pl
from jax.experimental.pallas import tpu as pltpu


# Largest spatial tile (lanes) used per grid step.  At f32 this is ~1.5 MiB of
# patches + ~2 MiB of output per step (~7 MiB double-buffered), which fits the
# 16 MiB scoped-VMEM default on v5e and leaves ample headroom on v6e/v7x.
_MAX_LANES = 8192


def _make_stem_kernel(eps: float):
    def stem_kernel(p_ref, w_ref, prm_ref, o_ref):
        # p_ref  : (1, K, T)  im2col patch tile         (K = Cin*kh*kw)
        # w_ref  : (C, K)     flattened conv weight     (resident, grid-invariant)
        # prm_ref: (C, 3)     [conv bias | LN gamma | LN beta]
        # o_ref  : (1, C, T)  output tile (channels on sublanes, spatial on lanes)
        p = p_ref[0]                                     # (K, T) native dtype
        w = w_ref[...]                                   # (C, K) native dtype

        # Conv as MXU matmul with f32 accumulation (no explicit operand upcast).
        y = jnp.dot(w, p, preferred_element_type=jnp.float32)   # (C, T) f32

        prm = prm_ref[...].astype(jnp.float32)           # (C, 3)
        y = y + prm[:, 0:1]                              # conv bias, lane-broadcast

        # Two-pass LayerNorm over channels (axis 0), per spatial position.
        u = jnp.mean(y, axis=0, keepdims=True)           # (1, T)
        d = y - u
        var = jnp.mean(d * d, axis=0, keepdims=True)     # (1, T)
        xn = d * lax.rsqrt(var + eps)
        out = prm[:, 1:2] * xn + prm[:, 2:3]             # gamma * xn + beta

        o_ref[0] = out.astype(o_ref.dtype)

    return stem_kernel


def _pick_spatial_tile(hw: int, batch: int, lane: int = 128,
                       max_lanes: int = _MAX_LANES) -> int:
    """Pick the spatial tile T (lanes per grid step along flattened H*W).

    - hw <= max_lanes: use the full extent (block == array dim is always legal;
      no padding, no masking, no post-kernel slice).  If batch == 1, split into
      two lane-aligned blocks so v7x's two TensorCores both get work.
    - hw  > max_lanes: use a large 128-multiple tile; the partial last block is
      handled by Pallas (OOB writes dropped), so no wrapper pad/slice either.
    """
    if hw <= max_lanes:
        if batch >= 2 or hw < 2 * lane:
            return hw
        return pl.cdiv(pl.cdiv(hw, 2), lane) * lane      # two lane-aligned blocks
    return max_lanes


def stem_forward(x, conv_w, conv_b, ln_w, ln_b, *, eps: float = 1e-5,
                 stride: int = 4, padding: int = 1):
    """Fused Conv2d(k=4, s=4, p=1) + LayerNorm2d (channels_first) forward.

    x      : (B, Cin, H, W)
    conv_w : (Cout, Cin, kh, kw)      conv_b : (Cout,)
    ln_w   : (Cout,)                  ln_b   : (Cout,)
    returns: (B, Cout, H_out, W_out)
    """
    B, Cin, H, W = x.shape
    Cout, Cin_w, KH, KW = conv_w.shape
    assert Cin == Cin_w
    # Space-to-depth patch extraction needs non-overlapping windows.
    # TODO(synk): general stride != kernel would need the strided-slice im2col.
    assert KH == stride and KW == stride

    H_out = (H + 2 * padding - KH) // stride + 1
    W_out = (W + 2 * padding - KW) // stride + 1
    HW = H_out * W_out
    K = Cin * KH * KW

    # --- im2col as one space-to-depth (single reshape+transpose) -------------
    xp = jnp.pad(x, ((0, 0), (0, 0), (padding, padding), (padding, padding)))
    xp = xp[:, :, :stride * H_out, :stride * W_out]
    patches = (xp.reshape(B, Cin, H_out, KH, W_out, KW)
                 .transpose(0, 1, 3, 5, 2, 4)            # (B, Cin, KH, KW, Ho, Wo)
                 .reshape(B, K, HW))                     # feature order (cin, kh, kw)

    T = _pick_spatial_tile(HW, B)
    n_spatial = pl.cdiv(HW, T)

    w2 = conv_w.reshape(Cout, K)
    params = jnp.stack([conv_b, ln_w, ln_b], axis=1)     # (Cout, 3) resident block

    kernel = _make_stem_kernel(eps)

    out = pl.pallas_call(
        kernel,
        out_shape=jax.ShapeDtypeStruct((B, Cout, HW), x.dtype),
        grid_spec=pltpu.PrefetchScalarGridSpec(
            num_scalar_prefetch=0,
            grid=(B, n_spatial),
            in_specs=[
                pl.BlockSpec((1, K, T), lambda bi, si: (bi, 0, si)),     # patches
                pl.BlockSpec((Cout, K), lambda bi, si: (0, 0)),          # conv weight
                pl.BlockSpec((Cout, 3), lambda bi, si: (0, 0)),          # bias/gamma/beta
            ],
            out_specs=pl.BlockSpec((1, Cout, T), lambda bi, si: (bi, 0, si)),
        ),
        compiler_params=pltpu.CompilerParams(
            dimension_semantics=("parallel", "parallel"),
        ),
    )(patches, w2, params)

    # HW = H_out * W_out exactly -> free metadata reshape, no slice.
    return out.reshape(B, Cout, H_out, W_out)


def stem_ref(x, conv_w, conv_b, ln_w, ln_b, eps: float = 1e-5):
    """Pure-JAX reference mirroring the PyTorch Stem_Op forward."""
    y = jax.lax.conv_general_dilated(
        x, conv_w, window_strides=(4, 4), padding=((1, 1), (1, 1)),
        dimension_numbers=("NCHW", "OIHW", "NCHW"),
        precision=jax.lax.Precision.HIGHEST)
    y = y + conv_b[None, :, None, None]
    u = jnp.mean(y, axis=1, keepdims=True)
    s = jnp.mean((y - u) ** 2, axis=1, keepdims=True)
    yn = (y - u) / jnp.sqrt(s + eps)
    return ln_w[None, :, None, None] * yn + ln_b[None, :, None, None]


if __name__ == "__main__":
    key = jax.random.PRNGKey(0)
    k1, k2, k3, k4, k5 = jax.random.split(key, 5)

    B, Cin, H, W = 2, 3, 16, 16
    Cout, KH, KW = 64, 4, 4

    x = jax.random.normal(k1, (B, Cin, H, W), dtype=jnp.float32)
    conv_w = 0.1 * jax.random.normal(k2, (Cout, Cin, KH, KW), dtype=jnp.float32)
    conv_b = 0.1 * jax.random.normal(k3, (Cout,), dtype=jnp.float32)
    ln_w = 1.0 + 0.1 * jax.random.normal(k4, (Cout,), dtype=jnp.float32)
    ln_b = 0.1 * jax.random.normal(k5, (Cout,), dtype=jnp.float32)

    out = stem_forward(x, conv_w, conv_b, ln_w, ln_b, eps=1e-5)
    out = jax.block_until_ready(out)

    ref = stem_ref(x, conv_w, conv_b, ln_w, ln_b, eps=1e-5)
    assert out.shape == ref.shape == (B, Cout, 4, 4)
    err = float(jnp.max(jnp.abs(out - ref)))
    assert jnp.allclose(out, ref, atol=1e-4, rtol=1e-4), f"max abs err = {err}"

    print("KERNEL_OK")
</pallas_src>

<mosaic_0001>
module attributes {stable_mosaic.version = 11 : i64} {
  func.func @stem_kernel(%arg0: i32, %arg1: i32, %arg2: memref<1x48x16xf32, #tpu.memory_space<vmem>>, %arg3: memref<64x48xf32, #tpu.memory_space<vmem>>, %arg4: memref<64x3xf32, #tpu.memory_space<vmem>>, %arg5: memref<1x64x16xf32, #tpu.memory_space<vmem>>) attributes {dimension_semantics = [#tpu.dimension_semantics<parallel>, #tpu.dimension_semantics<parallel>], iteration_bounds = array<i64: 2, 1>, scalar_prefetch = 0 : i64, scratch_operands = 0 : i64, tpu.core_type = #tpu.core_type<tc>, window_params = [{transform_indices = @transform_0, window_bounds = array<i64: 1, 48, 16>}, {pipeline_mode = #tpu.pipeline_mode<synchronous>, transform_indices = @transform_1, window_bounds = array<i64: 64, 48>}, {pipeline_mode = #tpu.pipeline_mode<synchronous>, transform_indices = @transform_2, window_bounds = array<i64: 64, 3>}, {transform_indices = @transform_3, window_bounds = array<i64: 1, 64, 16>}]} {
    %c0 = arith.constant 0 : index
    %c0_0 = arith.constant 0 : index
    %c0_1 = arith.constant 0 : index
    %0 = vector.load %arg2[%c0, %c0_0, %c0_1] : memref<1x48x16xf32, #tpu.memory_space<vmem>>, vector<1x48x16xf32>
    %1 = vector.shape_cast %0 : vector<1x48x16xf32> to vector<48x16xf32>
    %c0_2 = arith.constant 0 : index
    %c0_3 = arith.constant 0 : index
    %2 = vector.load %arg3[%c0_2, %c0_3] : memref<64x48xf32, #tpu.memory_space<vmem>>, vector<64x48xf32>
    %cst = arith.constant dense<0.000000e+00> : vector<64x16xf32>
    %3 = tpu.matmul %2, %1, %cst {dimension_numbers = #tpu.dot_dimension_numbers<[1], [0], [0], [1], [0, 0, 1, 1], [], []>} : vector<64x48xf32>, vector<48x16xf32>, vector<64x16xf32> -> vector<64x16xf32>
    %c0_4 = arith.constant 0 : index
    %c0_5 = arith.constant 0 : index
    %4 = vector.load %arg4[%c0_4, %c0_5] : memref<64x3xf32, #tpu.memory_space<vmem>>, vector<64x3xf32>
    %5 = vector.extract_strided_slice %4 {offsets = [0, 0], sizes = [64, 1], strides = [1, 1]} : vector<64x3xf32> to vector<64x1xf32>
    %6 = vector.broadcast %5 : vector<64x1xf32> to vector<64x16xf32>
    %7 = arith.addf %3, %6 : vector<64x16xf32>
    %cst_6 = arith.constant dense<0.000000e+00> : vector<16xf32>
    %8 = vector.multi_reduction <add>, %7, %cst_6 [0] : vector<64x16xf32> to vector<16xf32>
    %9 = vector.shape_cast %8 : vector<16xf32> to vector<1x16xf32>
    %cst_7 = arith.constant 6.400000e+01 : f32
    %10 = vector.broadcast %cst_7 : f32 to vector<1x16xf32>
    %11 = arith.divf %9, %10 : vector<1x16xf32>
    %12 = vector.broadcast %11 : vector<1x16xf32> to vector<64x16xf32>
    %13 = arith.subf %7, %12 : vector<64x16xf32>
    %14 = arith.mulf %13, %13 : vector<64x16xf32>
    %cst_8 = arith.constant dense<0.000000e+00> : vector<16xf32>
    %15 = vector.multi_reduction <add>, %14, %cst_8 [0] : vector<64x16xf32> to vector<16xf32>
    %16 = vector.shape_cast %15 : vector<16xf32> to vector<1x16xf32>
    %cst_9 = arith.constant 6.400000e+01 : f32
    %17 = vector.broadcast %cst_9 : f32 to vector<1x16xf32>
    %18 = arith.divf %16, %17 : vector<1x16xf32>
    %cst_10 = arith.constant 9.99999974E-6 : f32
    %19 = vector.broadcast %cst_10 : f32 to vector<1x16xf32>
    %20 = arith.addf %18, %19 : vector<1x16xf32>
    %21 = math.rsqrt %20 : vector<1x16xf32>
    %22 = vector.broadcast %21 : vector<1x16xf32> to vector<64x16xf32>
    %23 = arith.mulf %13, %22 : vector<64x16xf32>
    %24 = vector.extract_strided_slice %4 {offsets = [0, 1], sizes = [64, 1], strides = [1, 1]} : vector<64x3xf32> to vector<64x1xf32>
    %25 = vector.broadcast %24 : vector<64x1xf32> to vector<64x16xf32>
    %26 = arith.mulf %25, %23 : vector<64x16xf32>
    %27 = vector.extract_strided_slice %4 {offsets = [0, 2], sizes = [64, 1], strides = [1, 1]} : vector<64x3xf32> to vector<64x1xf32>
    %28 = vector.broadcast %27 : vector<64x1xf32> to vector<64x16xf32>
    %29 = arith.addf %26, %28 : vector<64x16xf32>
    %c0_11 = arith.constant 0 : index
    %c0_12 = arith.constant 0 : index
    %c0_13 = arith.constant 0 : index
    %30 = vector.load %arg5[%c0_11, %c0_12, %c0_13] : memref<1x64x16xf32, #tpu.memory_space<vmem>>, vector<1x64x16xf32>
    %31 = vector.shape_cast %30 : vector<1x64x16xf32> to vector<64x16xf32>
    %32 = vector.shape_cast %29 : vector<64x16xf32> to vector<1x64x16xf32>
    tpu.vector_store %arg5[%c0_11, %c0_12, %c0_13], %32 {strides = array<i32>} : memref<1x64x16xf32, #tpu.memory_space<vmem>>, vector<1x64x16xf32>,
    return
  }
  func.func @transform_0(%arg0: i32, %arg1: i32) -> (i32, i32, i32) {
    %c0_i32 = arith.constant 0 : i32
    %c0_i32_0 = arith.constant 0 : i32
    return %arg0, %c0_i32, %arg1 : i32, i32, i32
  }
  func.func @transform_1(%arg0: i32, %arg1: i32) -> (i32, i32) {
    %c0_i32 = arith.constant 0 : i32
    %c0_i32_0 = arith.constant 0 : i32
    %c0_i32_1 = arith.constant 0 : i32
    return %c0_i32, %c0_i32_0 : i32, i32
  }
  func.func @transform_2(%arg0: i32, %arg1: i32) -> (i32, i32) {
    %c0_i32 = arith.constant 0 : i32
    %c0_i32_0 = arith.constant 0 : i32
    %c0_i32_1 = arith.constant 0 : i32
    return %c0_i32, %c0_i32_0 : i32, i32
  }
  func.func @transform_3(%arg0: i32, %arg1: i32) -> (i32, i32, i32) {
    %c0_i32 = arith.constant 0 : i32
    %c0_i32_0 = arith.constant 0 : i32
    return %arg0, %c0_i32, %arg1 : i32, i32, i32
  }
}

</mosaic_0001>

<bundles_post_ra>
// kernel: tpu_custom_call.1
= control target key start
LH: loop header
LB: loop body
LE: loop exit
PB: predicated region body
PF: predicated region fallthrough
CT: control target
= control target key end

     0   :  { %s789_s12 = smov 0   ;;  %s791_s13 = smov 0   ;;  %s921_s0 = inlined_call_operand.vmem [shape: f32[2,48,16], index: 0, kind: input, shape index: {}]   ;;  %s922_s1 = inlined_call_operand.vmem [shape: f32[64,48], index: 1, kind: input, shape index: {}]   ;;  %s923_s2 = inlined_call_operand.vmem [shape: f32[64,3], index: 2, kind: input, shape index: {}]   ;;  %s924_s3 = inlined_call_operand.vmem [shape: f32[2,64,16], index: 3, kind: output, shape index: {}]  }
   0x1   :  { %s793_s14 = smov 0  }
   0x2 LB: > { %s25_s15 = sadd.s32 1, %s760_s13  ;;  %p641_p0 = scmp.ge.s32.totalorder %s764_s14, 1  ;;  %s764_s14 = sphi %s793_s14, %s13_s14   ;;  %s760_s13 = sphi %s791_s13, %s926_s13   ;;  %s756_s12 = sphi %s789_s12, %s925_s12  }
   0x3   : > { %p27_p1 = scmp.ge.s32.totalorder %s25_s15, 2  ;;  %p156_p2 = scmp.lt.s32.totalorder %s764_s14, 3 }
   0x5   : > { %s928_s15 = smov (%p27_p1, %s25_s15), 0  ;;  %p157_p3 = pnand %p641_p0, %p156_p2 }
   0x6   : > { %p186_p4 = scmp.lt.s32.totalorder (!%p157_p3), %s756_s12, 1 }
   0x7   : > { %160 = sbr.rel (%p157_p3) target bundleno = 316 (0x13c), region = 32 }
   0xc   : > { %v208_v0 = vld [vmem:[%s922_s1] sm:$0xff]  ;;  %vm264_vm0 = vcmask 392192   ;;  %s930_s12 = smov (!%p186_p4, %s756_s12), 1  ;;  %v766_v2 = vmov 0   ;;  %v826_v4 = vld [vmem:[%s923_s2 + $0x10] sm:$0xff]  ;;  %v833_v5 = vld [vmem:[%s923_s2 + $0x8] sm:$0xff] }
   0xd   : > { %v212_v1 = vld [vmem:[%s922_s1 + $0x20] sm:$0xff]  ;;  %682 = vmatprep.mubr.msk.f32.mxu0 %vm264_vm0, %v208_v0  ;;  %734 = vset.pattern.permute.xlu0 %v766_v2  ;;  %s706_s24 = smul.u32 48, %s930_s12  ;;  %v209_v12 = vld [vmem:[%s922_s1 + $0x8] sm:$0xff]  ;;  %v210_v14 = vld [vmem:[%s922_s1 + $0x10] sm:$0xff]  ;;  %v767_v23 = vmov 1   ;;  %v768_v24 = vmov 2  }
   0xe   : > { %688 = vmatprep.mubr.msk.f32.mxu1 %vm264_vm0, %v212_v1  ;;  %v820_v3 = vld [vmem:[%s923_s2] sm:$0xff]  ;;  %735 = vset.pattern.permute.xlu1 %v766_v2  ;;  %v213_v13 = vld [vmem:[%s922_s1 + $0x28] sm:$0xff]  ;;  %v214_v15 = vld [vmem:[%s922_s1 + $0x30] sm:$0xff]  ;;  %vm394_vm1 = vcmask 130048  }
   0xf   : > { %226 = vperm.xlu0 %734, %v820_v3   ;;  %236 = vperm.xlu1 %735, %v826_v4   ;;  %s193_s29 = scalar_lea.vmem %s921_s0, %s706_s24  ;;  %v219_v16 = vld [vmem:[%s923_s2 + $0x18] sm:$0xff]  ;;  %v220_v17 = vld [vmem:[%s923_s2 + $0x20] sm:$0xff]  ;;  %v221_v20 = vld [vmem:[%s923_s2 + $0x28] sm:$0xff] }
  0x10   : > { %v207_v6 = vld [vmem:[%s193_s29 + $0x28] sm:$0xff]  ;;  %v206_v7 = vld [vmem:[%s193_s29 + $0x20] sm:$0xff]  ;;  %v205_v8 = vld [vmem:[%s193_s29 + $0x18] sm:$0xff] }
  0x11   : > { %670 = vmatprep.subr.mxu0 %v207_v6  ;;  %694 = vmatprep.subr.mxu1 %v207_v6  ;;  %v204_v9 = vld [vmem:[%s193_s29 + $0x10] sm:$0xff]  ;;  %v203_v10 = vld [vmem:[%s193_s29 + $0x8] sm:$0xff]  ;;  %v202_v11 = vld [vmem:[%s193_s29] sm:$0xff]  ;;  %s655_s29 = sshll.u32 %s930_s12, 6 }
  0x12   : > { %671 = vmatpush3.msra.mxu0 %v207_v6  ;;  %700 = vmatpush3.msra.mxu1 %v207_v6  ;;  %v211_v18 = vld [vmem:[%s922_s1 + $0x18] sm:$0xff]  ;;  %v222_v21 = vld [vmem:[%s923_s2 + $0x30] sm:$0xff]  ;;  %s201_s5 = scalar_lea.vmem %s924_s3, %s655_s29 }
  0x13   : > { %231 = vperm.xlu0 %734, %v833_v5   ;;  %672 = vmatprep.subr.mxu0 %v206_v7  ;;  %v215_v19 = vld [vmem:[%s922_s1 + $0x38] sm:$0xff] }
  0x14   : > { %695 = vmatprep.subr.mxu1 %v206_v7  ;;  %673 = vmatpush3.msra.mxu0 %v206_v7  ;;  %v223_v22 = vld [vmem:[%s923_s2 + $0x38] sm:$0xff] }
  0x15   : > { %701 = vmatpush3.msra.mxu1 %v206_v7  ;;  %674 = vmatprep.subr.mxu0 %v205_v8 }
  0x16   : > { %696 = vmatprep.subr.mxu1 %v205_v8  ;;  %675 = vmatpush3.msra.mxu0 %v205_v8 }
  0x17   : > { %702 = vmatpush3.msra.mxu1 %v205_v8  ;;  %676 = vmatprep.subr.mxu0 %v204_v9 }
  0x18   : > { %697 = vmatprep.subr.mxu1 %v204_v9  ;;  %677 = vmatpush3.msra.mxu0 %v204_v9 }
  0x19   : > { %703 = vmatpush3.msra.mxu1 %v204_v9  ;;  %678 = vmatprep.subr.mxu0 %v203_v10 }
  0x1a   : > { %698 = vmatprep.subr.mxu1 %v203_v10  ;;  %679 = vmatpush3.msra.mxu0 %v203_v10 }
  0x1b   : > { %704 = vmatpush3.msra.mxu1 %v203_v10  ;;  %680 = vmatprep.subr.mxu0 %v202_v11 }
  0x1c   : > { %699 = vmatprep.subr.mxu1 %v202_v11  ;;  %681 = vmatpush3.msra.mxu0 %v202_v11 }
  0x1d   : > { %705 = vmatpush3.msra.mxu1 %v202_v11  ;;  %683 = vmatmul.mubr.msk.f32.vlgmr.msra.gmra.mxu0 %vm264_vm0, %v209_v12 }
  0x1e   : > { %689 = vmatmul.mubr.msk.f32.vlgmr.msra.gmra.mxu1 %vm264_vm0, %v213_v13  ;;  %685 = vmatprep.mubr.msk.f32.mxu0 %vm264_vm0, %v210_v14 }
  0x1f   : > { %691 = vmatprep.mubr.msk.f32.mxu1 %vm264_vm0, %v214_v15  ;;  %241 = vperm.xlu1 %735, %v219_v16  }
  0x20   : > { %246 = vperm.xlu0 %734, %v220_v17  }
  0x21   : > { %686 = vmatmul.mubr.msk.f32.gmra.mxu0 %vm264_vm0, %v211_v18 }
  0x22   : > { %692 = vmatmul.mubr.msk.f32.gmra.mxu1 %vm264_vm0, %v215_v19 }
  0x23   : > { %251 = vperm.xlu1 %735, %v221_v20  }
  0x24   : > { %256 = vperm.xlu0 %734, %v222_v21  }
  0x27   : > { %261 = vperm.xlu1 %735, %v223_v22  }
  0x28   : > { %736 = vset.pattern.permute.xlu0 %v767_v23 }
  0x29   : > { %467 = vperm.xlu0 %736, %v820_v3  }
  0x2b   : > { %737 = vset.pattern.permute.xlu1 %v767_v23 }
  0x2c   : > { %471 = vperm.xlu1 %737, %v833_v5  }
  0x2d   : > { %479 = vperm.xlu0 %736, %v219_v16  }
  0x30   : > { %475 = vperm.xlu1 %737, %v826_v4  }
  0x31   : > { %487 = vperm.xlu0 %736, %v221_v20  }
  0x34   : > { %483 = vperm.xlu1 %737, %v220_v17  }
  0x35   : > { %495 = vperm.xlu0 %736, %v223_v22  }
  0x38   : > { %491 = vperm.xlu1 %737, %v222_v21  }
  0x39   : > { %739 = vset.pattern.permute.xlu0 %v768_v24 }
  0x3a   : > { %511 = vperm.xlu0 %739, %v833_v5  }
  0x3c   : > { %738 = vset.pattern.permute.xlu1 %v768_v24 }
  0x3d   : > { %507 = vperm.xlu1 %738, %v820_v3  }
  0x3e   : > { %523 = vperm.xlu0 %739, %v220_v17  }
  0x41   : > { %515 = vperm.xlu1 %738, %v826_v4  }
  0x42   : > { %531 = vperm.xlu0 %739, %v222_v21  }
  0x45   : > { %519 = vperm.xlu1 %738, %v219_v16  }
  0x49   : > { %527 = vperm.xlu1 %738, %v221_v20  }
  0x4d   : > { %535 = vperm.xlu1 %738, %v223_v22  }
  0x8a   : > { %v227_v25 = vpop.permute.xlu0 %226  ;;  %v237_v26 = vpop.permute.xlu1 %236 }
  0x8e   : > { %v232_v27 = vpop.permute.xlu0 %231 }
  0x9a   : > { %v242_v28 = vpop.permute.xlu1 %241 }
  0x9b   : > { %v247_v36 = vpop.permute.xlu0 %246 }
  0x9e   : > { %v252_v37 = vpop.permute.xlu1 %251 }
  0x9f   : > { %v257_v51 = vpop.permute.xlu0 %256 }
  0xa2   : > { %v262_v52 = vpop.permute.xlu1 %261 }
  0xa7   : > { %v472_v19 = vpop.permute.xlu1 %471 }
  0xdd   : > { %v684_v29 = vpop.f32.mrf.mxu0 }
  0xde   : > { %v690_v30 = vpop.f32.mrf.mxu1  ;;  %v361_v33 = vadd.f32 %v684_v29, %v232_v27 }
  0xdf   : > { %v355_v31 = vpop.f32.mrf.mxu0  ;;  %v381_v49 = vadd.f32 %v690_v30, %v252_v37 }
  0xe0   : > { %v375_v32 = vpop.f32.mrf.mxu1  ;;  %v356_v34 = vadd.f32 %v355_v31, %v227_v25  ;;  %v396_v41 = vsel %vm394_vm1, %v361_v33, 0.0 }
  0xe1   : > { %v687_v35 = vpop.f32.mrf.mxu0  ;;  %v376_v45 = vadd.f32 %v375_v32, %v247_v36  ;;  %v404_v57 = vsel %vm394_vm1, %v381_v49, 0.0  ;;  %v476_v32 = vpop.permute.xlu1 %475 }
  0xe2   : > { %v395_v38 = vsel %vm394_vm1, %v356_v34, 0.0  ;;  %v693_v39 = vpop.f32.mrf.mxu1  ;;  %v371_v42 = vadd.f32 %v687_v35, %v242_v28 }
  0xe3   : > { %v365_v40 = vpop.f32.mrf.mxu0  ;;  %v397_v44 = vadd.f32 %v396_v41, %v395_v38  ;;  %v402_v54 = vsel %vm394_vm1, %v376_v45, 0.0  ;;  %v391_v58 = vadd.f32 %v693_v39, %v262_v52 }
  0xe4   : > { %v366_v43 = vadd.f32 %v365_v40, %v237_v26  ;;  %v385_v48 = vpop.f32.mrf.mxu1  ;;  %v400_v50 = vsel %vm394_vm1, %v371_v42, 0.0 }
  0xe5   : > { %v386_v55 = vadd.f32 %v385_v48, %v257_v51  ;;  %v408_v62 = vsel %vm394_vm1, %v391_v58, 0.0  ;;  %v484_v40 = vpop.permute.xlu1 %483 }
  0xe6   : > { %v398_v46 = vsel %vm394_vm1, %v366_v43, 0.0 }
  0xe7   : > { %v399_v47 = vadd.f32 %v398_v46, %v397_v44  ;;  %v406_v60 = vsel %vm394_vm1, %v386_v55, 0.0 }
  0xe9   : > { %v401_v53 = vadd.f32 %v400_v50, %v399_v47 }
  0xeb   : > { %v403_v56 = vadd.f32 %v402_v54, %v401_v53 }
  0xed   : > { %v405_v59 = vadd.f32 %v404_v57, %v403_v56 }
  0xef   : > { %v407_v61 = vadd.f32 %v406_v60, %v405_v59 }
  0xf1   : > { %v409_v63 = vadd.f32 %v408_v62, %v407_v61 }
  0xf3   : > { %v410_v0 = vrot.slane %v409_v63, 4 }
  0xf5   : > { %v411_v1 = vadd.f32 %v410_v0, %v409_v63 }
  0xf7   : > { %v412_v2 = vrot.slane %v411_v1, 2 }
  0xf9   : > { %v413_v3 = vadd.f32 %v412_v2, %v411_v1 }
  0xfb   : > { %v414_v4 = vrot.slane %v413_v3, 1 }
  0xfd   : > { %v415_v5 = vadd.f32 %v414_v4, %v413_v3 }
  0xff   : > { %v417_v6 = vmul.f32 0.015625, %v415_v5 }
 0x101   : > { %v418_v7 = vsub.f32 %v356_v34, %v417_v6  ;;  %v420_v8 = vsub.f32 %v366_v43, %v417_v6  ;;  %v421_v9 = vsub.f32 %v371_v42, %v417_v6  ;;  %v419_v10 = vsub.f32 %v361_v33, %v417_v6  ;;  %v468_v42 = vpop.permute.xlu0 %467 }
 0x102   : > { %v422_v12 = vsub.f32 %v376_v45, %v417_v6  ;;  %v423_v16 = vsub.f32 %v381_v49, %v417_v6  ;;  %v424_v21 = vsub.f32 %v386_v55, %v417_v6  ;;  %v425_v25 = vsub.f32 %v391_v58, %v417_v6  ;;  %v492_v45 = vpop.permute.xlu1 %491 }
 0x103   : > { %v426_v11 = vmul.f32 %v418_v7, %v418_v7  ;;  %v427_v13 = vmul.f32 %v419_v10, %v419_v10  ;;  %v428_v14 = vmul.f32 %v420_v8, %v420_v8  ;;  %v429_v17 = vmul.f32 %v421_v9, %v421_v9 }
 0x104   : > { %v430_v22 = vmul.f32 %v422_v12, %v422_v12  ;;  %v431_v26 = vmul.f32 %v423_v16, %v423_v16  ;;  %v432_v29 = vmul.f32 %v424_v21, %v424_v21  ;;  %v433_v33 = vmul.f32 %v425_v25, %v425_v25 }
 0x105   : > { %v434_v15 = vsel %vm394_vm1, %v426_v11, 0.0  ;;  %v435_v18 = vsel %vm394_vm1, %v427_v13, 0.0  ;;  %v437_v23 = vsel %vm394_vm1, %v428_v14, 0.0  ;;  %v439_v27 = vsel %vm394_vm1, %v429_v17, 0.0  ;;  %v480_v47 = vpop.permute.xlu0 %479 }
 0x106   : > { %v436_v20 = vadd.f32 %v435_v18, %v434_v15  ;;  %v441_v30 = vsel %vm394_vm1, %v430_v22, 0.0  ;;  %v443_v34 = vsel %vm394_vm1, %v431_v26, 0.0  ;;  %v445_v36 = vsel %vm394_vm1, %v432_v29, 0.0  ;;  %v508_v50 = vpop.permute.xlu1 %507 }
 0x107   : > { %v447_v38 = vsel %vm394_vm1, %v433_v33, 0.0 }
 0x108   : > { %v438_v24 = vadd.f32 %v437_v23, %v436_v20 }
 0x109   : > { %v488_v52 = vpop.permute.xlu0 %487 }
 0x10a   : > { %v440_v28 = vadd.f32 %v439_v27, %v438_v24  ;;  %v516_v54 = vpop.permute.xlu1 %515 }
 0x10c   : > { %v442_v31 = vadd.f32 %v441_v30, %v440_v28 }
 0x10d   : > { %v496_v55 = vpop.permute.xlu0 %495 }
 0x10e   : > { %v444_v35 = vadd.f32 %v443_v34, %v442_v31  ;;  %v520_v56 = vpop.permute.xlu1 %519 }
 0x110   : > { %v446_v37 = vadd.f32 %v445_v36, %v444_v35 }
 0x111   : > { %v512_v57 = vpop.permute.xlu0 %511 }
 0x112   : > { %v448_v39 = vadd.f32 %v447_v38, %v446_v37  ;;  %v528_v58 = vpop.permute.xlu1 %527 }
 0x114   : > { %v449_v41 = vrot.slane %v448_v39, 4 }
 0x115   : > { %v524_v59 = vpop.permute.xlu0 %523 }
 0x116   : > { %v450_v43 = vadd.f32 %v449_v41, %v448_v39 }
 0x118   : > { %v451_v44 = vrot.slane %v450_v43, 2 }
 0x11a   : > { %v452_v46 = vadd.f32 %v451_v44, %v450_v43 }
 0x11c   : > { %v453_v48 = vrot.slane %v452_v46, 1 }
 0x11e   : > { %v454_v49 = vadd.f32 %v453_v48, %v452_v46 }
 0x120   : > { %v455_v51 = vmul.f32 0.015625, %v454_v49 }
 0x122   : > { %v456_v53 = vadd.f32 1e-05, %v455_v51 }
 0x124   : > { %740 = vrsqrt.f32 %v456_v53 }
 0x131   : > { %v741_v60 = vpop.eup %740 }
 0x132   : > { %v459_v61 = vmul.f32 %v741_v60, %v419_v10  ;;  %v460_v62 = vmul.f32 %v741_v60, %v420_v8  ;;  %v462_v63 = vmul.f32 %v741_v60, %v422_v12  ;;  %v458_v0 = vmul.f32 %v741_v60, %v418_v7  ;;  %v536_v12 = vpop.permute.xlu1 %535 }
 0x133   : > { %v464_v1 = vmul.f32 %v741_v60, %v424_v21  ;;  %v461_v2 = vmul.f32 %v741_v60, %v421_v9  ;;  %v463_v3 = vmul.f32 %v741_v60, %v423_v16  ;;  %v465_v4 = vmul.f32 %v741_v60, %v425_v25  ;;  %v532_v9 = vpop.permute.xlu0 %531 }
 0x134   : > { %v499_v5 = vmul.f32 %v472_v19, %v459_v61  ;;  %v500_v6 = vmul.f32 %v476_v32, %v460_v62  ;;  %v502_v11 = vmul.f32 %v484_v40, %v462_v63  ;;  %v498_v13 = vmul.f32 %v468_v42, %v458_v0 }
 0x135   : > { %v504_v14 = vmul.f32 %v492_v45, %v464_v1  ;;  %v501_v15 = vmul.f32 %v480_v47, %v461_v2  ;;  %v503_v17 = vmul.f32 %v488_v52, %v463_v3  ;;  %v505_v18 = vmul.f32 %v496_v55, %v465_v4 }
 0x136   : > { %v538_v10 = vadd.f32 %v508_v50, %v498_v13  ;;  %v540_v8 = vadd.f32 %v516_v54, %v500_v6  ;;  %v539_v7 = vadd.f32 %v512_v57, %v499_v5  ;;  %v542_v20 = vadd.f32 %v524_v59, %v502_v11 }
 0x137   : > { %v541_v16 = vadd.f32 %v520_v56, %v501_v15  ;;  %v543_v21 = vadd.f32 %v528_v58, %v503_v17  ;;  %v545_v19 = vadd.f32 %v536_v12, %v505_v18  ;;  %v544_v22 = vadd.f32 %v532_v9, %v504_v14 }
 0x138   : > { %546 = vst.msk [vmem:[%s201_s5] sm:$0xff] %vm394_vm1, %v538_v10  ;;  %548 = vst.msk [vmem:[%s201_s5 + $0x10] sm:$0xff] %vm394_vm1, %v540_v8 }
 0x139   : > { %547 = vst.msk [vmem:[%s201_s5 + $0x8] sm:$0xff] %vm394_vm1, %v539_v7  ;;  %550 = vst.msk [vmem:[%s201_s5 + $0x20] sm:$0xff] %vm394_vm1, %v542_v20 }
 0x13a   : > { %549 = vst.msk [vmem:[%s201_s5 + $0x18] sm:$0xff] %vm394_vm1, %v541_v16  ;;  %551 = vst.msk [vmem:[%s201_s5 + $0x28] sm:$0xff] %vm394_vm1, %v543_v21 }
 0x13b   : > { %553 = vst.msk [vmem:[%s201_s5 + $0x38] sm:$0xff] %vm394_vm1, %v545_v19  ;;  %552 = vst.msk [vmem:[%s201_s5 + $0x30] sm:$0xff] %vm394_vm1, %v544_v22 }
 0x13c PF: > { %s13_s14 = sadd.s32 1, %s764_s14   ;;  %s925_s12 = smov %s760_s13 }
 0x13d   : > { %p10_p5 = scmp.ge.s32.totalorder %s13_s14, 4   ;;  %s926_s13 = smov %s928_s15 }
 0x13f   :  { %12 = sbr.rel (!%p10_p5) target bundleno = 2 (0x2), region = 62 }

</bundles_post_ra>
